<compile_context>
chip_gen: v7x
topology: tpu7x:2x2x1
jax: 0.10.0
libtpu: 0.0.40
codegen_flags: <defaults>
</compile_context>

<pallas_src>
import jax
import jax.numpy as jnp
from jax.experimental import pallas as pl
from jax.experimental.pallas import tpu as pltpu


def _mlp_exp_kernel(x_ref, w1_ref, b1_ref, w2_ref, b2_ref, w3_ref, b3_ref, o_ref):
    # Feature-major: features on sublanes, batch on the (fast) 128-lane axis.
    x = x_ref[...]                                   # [5, TB] f32
    x1 = x[0:1, :]                                   # [1, TB] f32 (epilogue)
    xr = x[1:5, :].astype(jnp.bfloat16)              # [4, TB] bf16 (MXU feed)

    # Linear(4,64) + ReLU   (bf16 operands, f32 accumulate)
    h1 = jnp.dot(w1_ref[...], xr, preferred_element_type=jnp.float32) + b1_ref[...]
    h1 = jnp.maximum(h1, 0.0)                        # [64, TB] f32

    # Linear(64,32) + ReLU
    h2 = jnp.dot(w2_ref[...], h1.astype(jnp.bfloat16),
                 preferred_element_type=jnp.float32) + b2_ref[...]
    h2 = jnp.maximum(h2, 0.0)                        # [32, TB] f32

    # Linear(32,3)
    h3 = jnp.dot(w3_ref[...], h2.astype(jnp.bfloat16),
                 preferred_element_type=jnp.float32) + b3_ref[...]   # [3, TB] f32

    a1 = h3[0:1, :]                                  # cheap sublane slices
    a2 = h3[1:2, :]
    a3 = h3[2:3, :]

    # exp(a1) * exp(-exp(a2) * x1) + a3  ==  exp(a1 - exp(a2) * x1) + a3
    o_ref[...] = (jnp.exp(a1 - jnp.exp(a2) * x1) + a3).astype(o_ref.dtype)


def _round_up(a, b):
    return ((a + b - 1) // b) * b


def complex_exponential_forward_fm(x_fm, params, *, tb=4096):
    """Feature-major entry point (no input relayout).

    x_fm: [5, B] float32, row 0 = x1, rows 1..4 = MLP input.
    params: dict with w1 [64,4], b1 [64,1], w2 [32,64], b2 [32,1],
            w3 [3,32], b3 [3,1] (PyTorch-style [out, in]), float32.
    Returns [1, B] float32.
    """
    F, B = x_fm.shape
    assert F == 5
    assert tb % 128 == 0, "batch tile cap must be a multiple of 128 lanes"

    # bf16 weights: cast once (tiny, resident across all grid steps).
    w1 = params["w1"].astype(jnp.bfloat16)
    w2 = params["w2"].astype(jnp.bfloat16)
    w3 = params["w3"].astype(jnp.bfloat16)
    b1, b2, b3 = params["b1"], params["b2"], params["b3"]

    # Tile sizing: >=2 grid steps whenever B allows (both v7x TCs get work),
    # capped at tb; prefer an even step count for 2-TC balance.
    tb_eff = max(128, min(tb, _round_up(pl.cdiv(B, 2), 128)))
    n_steps = pl.cdiv(B, tb_eff)
    if n_steps > 1 and n_steps % 2 == 1:
        tb_eff = max(128, min(tb, _round_up(pl.cdiv(B, n_steps + 1), 128)))
        n_steps = pl.cdiv(B, tb_eff)

    flops = 2 * B * (4 * 64 + 64 * 32 + 32 * 3) + 6 * B
    bytes_accessed = (4 * (5 * B + B + b1.size + b2.size + b3.size)
                      + 2 * (w1.size + w2.size + w3.size))
    cost = pl.CostEstimate(flops=flops, transcendentals=2 * B,
                           bytes_accessed=bytes_accessed)

    out_fm = pl.pallas_call(
        _mlp_exp_kernel,
        out_shape=jax.ShapeDtypeStruct((1, B), jnp.float32),
        grid_spec=pltpu.PrefetchScalarGridSpec(
            num_scalar_prefetch=0,
            grid=(n_steps,),
            in_specs=[
                pl.BlockSpec((5, tb_eff), lambda i: (0, i)),   # x tile (feature-major)
                pl.BlockSpec((64, 4), lambda i: (0, 0)),       # w1 (bf16, resident)
                pl.BlockSpec((64, 1), lambda i: (0, 0)),       # b1
                pl.BlockSpec((32, 64), lambda i: (0, 0)),      # w2 (bf16)
                pl.BlockSpec((32, 1), lambda i: (0, 0)),       # b2
                pl.BlockSpec((3, 32), lambda i: (0, 0)),       # w3 (bf16)
                pl.BlockSpec((3, 1), lambda i: (0, 0)),        # b3
            ],
            out_specs=pl.BlockSpec((1, tb_eff), lambda i: (0, i)),  # lane-dense slab
        ),
        compiler_params=pltpu.CompilerParams(
            dimension_semantics=("parallel",),   # batch tiles shard across TCs
        ),
        cost_estimate=cost,
    )(x_fm, w1, b1, w2, b2, w3, b3)
    return out_fm


def complex_exponential_forward(x, params, *, tb=4096):
    """PyTorch-parity entry point. x: [B, 5] float32 -> [B, 1] float32."""
    B, F = x.shape
    assert F == 5
    out_fm = complex_exponential_forward_fm(x.T, params, tb=tb)   # [1, B]
    # [1,B] and [B,1] share the same row-major data order -> free-ish reshape.
    return out_fm.reshape(B, 1)


def init_params(key):
    """PyTorch-Linear init (U[-1/sqrt(fan_in), 1/sqrt(fan_in)]), [out, in] layout."""
    def linear(key, fan_in, fan_out):
        kw, kb = jax.random.split(key)
        bound = 1.0 / jnp.sqrt(jnp.float32(fan_in))
        w = jax.random.uniform(kw, (fan_out, fan_in), jnp.float32, -bound, bound)
        b = jax.random.uniform(kb, (fan_out, 1), jnp.float32, -bound, bound)
        return w, b

    k1, k2, k3 = jax.random.split(key, 3)
    w1, b1 = linear(k1, 4, 64)
    w2, b2 = linear(k2, 64, 32)
    w3, b3 = linear(k3, 32, 3)
    return {"w1": w1, "b1": b1, "w2": w2, "b2": b2, "w3": w3, "b3": b3}


def reference_forward(x, p):
    """Pure-f32 JAX reference of the PyTorch forward (unfused exponentials)."""
    x1 = x[:, 0:1]
    xr = x[:, 1:5]
    h = jnp.maximum(xr @ p["w1"].T + p["b1"].T, 0.0)
    h = jnp.maximum(h @ p["w2"].T + p["b2"].T, 0.0)
    h = h @ p["w3"].T + p["b3"].T
    a1 = jnp.exp(h[:, 0:1])
    a2 = jnp.exp(h[:, 1:2])
    a3 = h[:, 2:3]
    return a1 * jnp.exp(-a2 * x1) + a3


if __name__ == "__main__":
    key = jax.random.PRNGKey(0)
    kp, kx1, kx2 = jax.random.split(key, 3)
    params = init_params(kp)

    # Kernel uses bf16 MXU operands (f32 accumulate); reference is pure f32,
    # so tolerances are set to bf16-level (~1e-2 rel worst case).
    ATOL, RTOL = 5e-2, 2e-2

    # Check 1: tiny ragged batch (single partial block, B < 128 lanes).
    B1 = 37
    x_a = jax.random.normal(kx1, (B1, 5), jnp.float32)
    fwd = jax.jit(lambda x, p: complex_exponential_forward(x, p))
    out_a = jax.block_until_ready(fwd(x_a, params))
    ref_a = reference_forward(x_a, params)
    assert out_a.shape == (B1, 1)
    assert jnp.allclose(out_a, ref_a, atol=ATOL, rtol=RTOL)

    # Check 2: multi-step grid with even step count + masked tail
    # (B=300 -> tb_eff=256, 2 steps, last block 44 valid lanes).
    B2 = 300
    x_b = jax.random.normal(kx2, (B2, 5), jnp.float32)
    out_b = jax.block_until_ready(fwd(x_b, params))
    ref_b = reference_forward(x_b, params)
    assert out_b.shape == (B2, 1)
    assert jnp.allclose(out_b, ref_b, atol=ATOL, rtol=RTOL)

    # Check 3: explicit small tile cap -> 3-step grid (tile cap binds, odd steps).
    fwd_small_tile = jax.jit(lambda x, p: complex_exponential_forward(x, p, tb=128))
    out_c = jax.block_until_ready(fwd_small_tile(x_b, params))
    assert out_c.shape == (B2, 1)
    assert jnp.allclose(out_c, ref_b, atol=ATOL, rtol=RTOL)

    print("KERNEL_OK")
</pallas_src>

<mosaic_0001>
module attributes {stable_mosaic.version = 11 : i64} {
  func.func @_mlp_exp_kernel(%arg0: i32, %arg1: memref<5x128xf32, #tpu.memory_space<vmem>>, %arg2: memref<64x4xbf16, #tpu.memory_space<vmem>>, %arg3: memref<64x1xf32, #tpu.memory_space<vmem>>, %arg4: memref<32x64xbf16, #tpu.memory_space<vmem>>, %arg5: memref<32x1xf32, #tpu.memory_space<vmem>>, %arg6: memref<3x32xbf16, #tpu.memory_space<vmem>>, %arg7: memref<3x1xf32, #tpu.memory_space<vmem>>, %arg8: memref<1x128xf32, #tpu.memory_space<vmem>>) attributes {dimension_semantics = [#tpu.dimension_semantics<parallel>], iteration_bounds = array<i64: 1>, scalar_prefetch = 0 : i64, scratch_operands = 0 : i64, tpu.core_type = #tpu.core_type<tc>, window_params = [{transform_indices = @transform_0, window_bounds = array<i64: 5, 128>}, {pipeline_mode = #tpu.pipeline_mode<synchronous>, transform_indices = @transform_1, window_bounds = array<i64: 64, 4>}, {pipeline_mode = #tpu.pipeline_mode<synchronous>, transform_indices = @transform_2, window_bounds = array<i64: 64, 1>}, {pipeline_mode = #tpu.pipeline_mode<synchronous>, transform_indices = @transform_3, window_bounds = array<i64: 32, 64>}, {pipeline_mode = #tpu.pipeline_mode<synchronous>, transform_indices = @transform_4, window_bounds = array<i64: 32, 1>}, {pipeline_mode = #tpu.pipeline_mode<synchronous>, transform_indices = @transform_5, window_bounds = array<i64: 3, 32>}, {pipeline_mode = #tpu.pipeline_mode<synchronous>, transform_indices = @transform_6, window_bounds = array<i64: 3, 1>}, {transform_indices = @transform_7, window_bounds = array<i64: 1, 128>}]} {
    %c0 = arith.constant 0 : index
    %c0_0 = arith.constant 0 : index
    %0 = vector.load %arg1[%c0, %c0_0] : memref<5x128xf32, #tpu.memory_space<vmem>>, vector<5x128xf32>
    %1 = vector.extract_strided_slice %0 {offsets = [0, 0], sizes = [1, 128], strides = [1, 1]} : vector<5x128xf32> to vector<1x128xf32>
    %2 = vector.extract_strided_slice %0 {offsets = [1, 0], sizes = [4, 128], strides = [1, 1]} : vector<5x128xf32> to vector<4x128xf32>
    %3 = arith.truncf %2 : vector<4x128xf32> to vector<4x128xbf16>
    %c0_1 = arith.constant 0 : index
    %c0_2 = arith.constant 0 : index
    %4 = vector.load %arg2[%c0_1, %c0_2] : memref<64x4xbf16, #tpu.memory_space<vmem>>, vector<64x4xbf16>
    %cst = arith.constant dense<0.000000e+00> : vector<64x128xf32>
    %5 = tpu.matmul %4, %3, %cst {dimension_numbers = #tpu.dot_dimension_numbers<[1], [0], [0], [1], [0, 0, 1, 1], [], []>} : vector<64x4xbf16>, vector<4x128xbf16>, vector<64x128xf32> -> vector<64x128xf32>
    %c0_3 = arith.constant 0 : index
    %c0_4 = arith.constant 0 : index
    %6 = vector.load %arg3[%c0_3, %c0_4] : memref<64x1xf32, #tpu.memory_space<vmem>>, vector<64x1xf32>
    %7 = vector.broadcast %6 : vector<64x1xf32> to vector<64x128xf32>
    %8 = arith.addf %5, %7 : vector<64x128xf32>
    %cst_5 = arith.constant 0.000000e+00 : f32
    %9 = vector.broadcast %cst_5 : f32 to vector<64x128xf32>
    %10 = arith.maximumf %8, %9 : vector<64x128xf32>
    %c0_6 = arith.constant 0 : index
    %c0_7 = arith.constant 0 : index
    %11 = vector.load %arg4[%c0_6, %c0_7] : memref<32x64xbf16, #tpu.memory_space<vmem>>, vector<32x64xbf16>
    %12 = arith.truncf %10 : vector<64x128xf32> to vector<64x128xbf16>
    %cst_8 = arith.constant dense<0.000000e+00> : vector<32x128xf32>
    %13 = tpu.matmul %11, %12, %cst_8 {dimension_numbers = #tpu.dot_dimension_numbers<[1], [0], [0], [1], [0, 0, 1, 1], [], []>} : vector<32x64xbf16>, vector<64x128xbf16>, vector<32x128xf32> -> vector<32x128xf32>
    %c0_9 = arith.constant 0 : index
    %c0_10 = arith.constant 0 : index
    %14 = vector.load %arg5[%c0_9, %c0_10] : memref<32x1xf32, #tpu.memory_space<vmem>>, vector<32x1xf32>
    %15 = vector.broadcast %14 : vector<32x1xf32> to vector<32x128xf32>
    %16 = arith.addf %13, %15 : vector<32x128xf32>
    %cst_11 = arith.constant 0.000000e+00 : f32
    %17 = vector.broadcast %cst_11 : f32 to vector<32x128xf32>
    %18 = arith.maximumf %16, %17 : vector<32x128xf32>
    %c0_12 = arith.constant 0 : index
    %c0_13 = arith.constant 0 : index
    %19 = vector.load %arg6[%c0_12, %c0_13] : memref<3x32xbf16, #tpu.memory_space<vmem>>, vector<3x32xbf16>
    %20 = arith.truncf %18 : vector<32x128xf32> to vector<32x128xbf16>
    %cst_14 = arith.constant dense<0.000000e+00> : vector<3x128xf32>
    %21 = tpu.matmul %19, %20, %cst_14 {dimension_numbers = #tpu.dot_dimension_numbers<[1], [0], [0], [1], [0, 0, 1, 1], [], []>} : vector<3x32xbf16>, vector<32x128xbf16>, vector<3x128xf32> -> vector<3x128xf32>
    %c0_15 = arith.constant 0 : index
    %c0_16 = arith.constant 0 : index
    %22 = vector.load %arg7[%c0_15, %c0_16] : memref<3x1xf32, #tpu.memory_space<vmem>>, vector<3x1xf32>
    %23 = vector.broadcast %22 : vector<3x1xf32> to vector<3x128xf32>
    %24 = arith.addf %21, %23 : vector<3x128xf32>
    %25 = vector.extract_strided_slice %24 {offsets = [0, 0], sizes = [1, 128], strides = [1, 1]} : vector<3x128xf32> to vector<1x128xf32>
    %26 = vector.extract_strided_slice %24 {offsets = [1, 0], sizes = [1, 128], strides = [1, 1]} : vector<3x128xf32> to vector<1x128xf32>
    %27 = vector.extract_strided_slice %24 {offsets = [2, 0], sizes = [1, 128], strides = [1, 1]} : vector<3x128xf32> to vector<1x128xf32>
    %28 = math.exp %26 : vector<1x128xf32>
    %29 = arith.mulf %28, %1 : vector<1x128xf32>
    %30 = arith.subf %25, %29 : vector<1x128xf32>
    %31 = math.exp %30 : vector<1x128xf32>
    %32 = arith.addf %31, %27 : vector<1x128xf32>
    %c0_17 = arith.constant 0 : index
    %c0_18 = arith.constant 0 : index
    %33 = vector.load %arg8[%c0_17, %c0_18] : memref<1x128xf32, #tpu.memory_space<vmem>>, vector<1x128xf32>
    tpu.vector_store %arg8[%c0_17, %c0_18], %32 {strides = array<i32>} : memref<1x128xf32, #tpu.memory_space<vmem>>, vector<1x128xf32>,
    return
  }
  func.func @transform_0(%arg0: i32) -> (i32, i32) {
    %c0_i32 = arith.constant 0 : i32
    %c0_i32_0 = arith.constant 0 : i32
    return %c0_i32, %arg0 : i32, i32
  }
  func.func @transform_1(%arg0: i32) -> (i32, i32) {
    %c0_i32 = arith.constant 0 : i32
    %c0_i32_0 = arith.constant 0 : i32
    %c0_i32_1 = arith.constant 0 : i32
    return %c0_i32, %c0_i32_0 : i32, i32
  }
  func.func @transform_2(%arg0: i32) -> (i32, i32) {
    %c0_i32 = arith.constant 0 : i32
    %c0_i32_0 = arith.constant 0 : i32
    %c0_i32_1 = arith.constant 0 : i32
    return %c0_i32, %c0_i32_0 : i32, i32
  }
  func.func @transform_3(%arg0: i32) -> (i32, i32) {
    %c0_i32 = arith.constant 0 : i32
    %c0_i32_0 = arith.constant 0 : i32
    %c0_i32_1 = arith.constant 0 : i32
    return %c0_i32, %c0_i32_0 : i32, i32
  }
  func.func @transform_4(%arg0: i32) -> (i32, i32) {
    %c0_i32 = arith.constant 0 : i32
    %c0_i32_0 = arith.constant 0 : i32
    %c0_i32_1 = arith.constant 0 : i32
    return %c0_i32, %c0_i32_0 : i32, i32
  }
  func.func @transform_5(%arg0: i32) -> (i32, i32) {
    %c0_i32 = arith.constant 0 : i32
    %c0_i32_0 = arith.constant 0 : i32
    %c0_i32_1 = arith.constant 0 : i32
    return %c0_i32, %c0_i32_0 : i32, i32
  }
  func.func @transform_6(%arg0: i32) -> (i32, i32) {
    %c0_i32 = arith.constant 0 : i32
    %c0_i32_0 = arith.constant 0 : i32
    %c0_i32_1 = arith.constant 0 : i32
    return %c0_i32, %c0_i32_0 : i32, i32
  }
  func.func @transform_7(%arg0: i32) -> (i32, i32) {
    %c0_i32 = arith.constant 0 : i32
    %c0_i32_0 = arith.constant 0 : i32
    return %c0_i32, %arg0 : i32, i32
  }
}

</mosaic_0001>

<bundles_post_ra>
// kernel: _lambda_.1
= control target key start
LH: loop header
LB: loop body
LE: loop exit
PB: predicated region body
PF: predicated region fallthrough
CT: control target
= control target key end

     0   :  { %vm113_vm0 = vcmask 31744   ;;  %v487_v5 = vmov 0   ;;  %vm126_vm1 = vcmask 1041408   ;;  %s617_s0 = inlined_call_operand.vmem [shape: f32[5,37], index: 0, kind: input, shape index: {}]   ;;  %s618_s1 = inlined_call_operand.vmem [shape: bf16[64,4], index: 1, kind: input, shape index: {}]   ;;  %s619_s2 = inlined_call_operand.vmem [shape: f32[64,1], index: 2, kind: input, shape index: {}]   ;;  %s620_s3 = inlined_call_operand.vmem [shape: bf16[32,64], index: 3, kind: input, shape index: {}]   ;;  %s621_s4 = inlined_call_operand.vmem [shape: f32[32,1], index: 4, kind: input, shape index: {}]   ;;  %s622_s5 = inlined_call_operand.vmem [shape: bf16[3,32], index: 5, kind: input, shape index: {}]   ;;  %s623_s6 = inlined_call_operand.vmem [shape: f32[3,1], index: 6, kind: input, shape index: {}]   ;;  %s624_s7 = inlined_call_operand.hbm [shape: f32[1,37], index: 7, kind: output, shape index: {}]  }
   0x1   :  { %v534_v0 = vld [vmem:[%s617_s0] sm:$0x1f]  ;;  %451 = vset.pattern.permute.xlu0 %v487_v5  ;;  %452 = vset.pattern.permute.xlu1 %v487_v5  ;;  %v40_v8 = vld [vmem:[%s619_s2 + $0x10] sm:$0xff]  ;;  %v39_v9 = vld [vmem:[%s619_s2 + $0x8] sm:$0xff] }
   0x2   :  { %v453_v1 = vld [vmem:[%s618_s1] sm:$0xff]   ;;  %v29_v2 = vpack.c.bf16 %v534_v0, %v534_v0  ;;  %58 = vperm.xlu1 %452, %v40_v8   ;;  %v41_v11 = vld [vmem:[%s619_s2 + $0x18] sm:$0xff]  ;;  %v454_v12 = vld [vmem:[%s618_s1 + $0x8] sm:$0xff]  }
   0x3   :  { %418 = vmatprep.mubr.msk.bf16.mxu0 %vm113_vm0, %v453_v1  ;;  %v38_v6 = vld [vmem:[%s619_s2] sm:$0xff]  ;;  %v455_v13 = vld [vmem:[%s618_s1 + $0x10] sm:$0xff]  }
   0x4   :  { %v107_v3 = vshrl.u32 %v29_v2, 16  ;;  %v109_v4 = vshll.u32 %v29_v2, 16  ;;  %48 = vperm.xlu0 %451, %v38_v6   ;;  %v42_v15 = vld [vmem:[%s619_s2 + $0x20] sm:$0xff] }
   0x6   :  { %v111_v7 = vrot.slane %v109_v4, 1  ;;  %63 = vperm.xlu1 %452, %v41_v11  }
   0x8   :  { %v112_v10 = vor.u32 %v111_v7, %v107_v3  ;;  %53 = vperm.xlu0 %451, %v39_v9  }
   0xa   :  { %446 = vmatprep.subr.msk.bf16.mxu0 %vm126_vm1, %v112_v10  ;;  %v128_v14 = vsel %vm126_vm1, %v112_v10, 0 }
   0xb   :  { %417 = vmatpush3.bf16.msra.mxu0 %v128_v14 }
   0xc   :  { %12 = vsyncpa [#allocation3], 0  ;;  %v43_v16 = vld [vmem:[%s619_s2 + $0x28] sm:$0xff]  ;;  %68 = vperm.xlu0 %451, %v42_v15   ;;  %v44_v17 = vld [vmem:[%s619_s2 + $0x30] sm:$0xff]  ;;  %vm245_vm2 = vcmask 523264   ;;  %v488_v63 = vmov 0.0  }
   0xd   :  { %73 = vperm.xlu1 %452, %v43_v16   ;;  %v45_v18 = vld [vmem:[%s619_s2 + $0x38] sm:$0xff]  ;;  %v211_v20 = vld [vmem:[%s621_s4] sm:$0xff]  ;;  %v212_v21 = vld [vmem:[%s621_s4 + $0x8] sm:$0xff]  ;;  %438 = vmatprep.subr.bf16.mxu0 %v488_v63  ;;  %vm489_vm3 = vmmov 0   ;;  %vm314_vm4 = vcmask 261120   ;;  %s490_s13 = smov [#allocation2]  }
   0xe   :  { %419 = vmatmul.mubr.msk.bf16.vlgmr.msra.gmra.mrb[0].mxu0 %vm113_vm0, %v454_v12  ;;  %v456_v19 = vld [vmem:[%s618_s1 + $0x18] sm:$0xff]   ;;  %v213_v22 = vld [vmem:[%s621_s4 + $0x10] sm:$0xff]  ;;  %v308_v24 = vld [vmem:[%s623_s6] sm:$0x7] }
   0xf   :  { %422 = vmatprep.mubr.msk.bf16.mxu0 %vm113_vm0, %v455_v13  ;;  %v214_v23 = vld [vmem:[%s621_s4 + $0x18] sm:$0xff]  ;;  %v457_v25 = vld [vmem:[%s620_s3] sm:$0xff]   ;;  %v458_v62 = vld [vmem:[%s620_s3 + $0x8] sm:$0xff]  }
  0x10   :  { %78 = vperm.xlu0 %451, %v44_v17   ;;  %434 = vmatprep.mubr.msk.bf16.mxu1 %vm245_vm2, %v457_v25 }
  0x11   :  { %83 = vperm.xlu1 %452, %v45_v18  }
  0x14   :  { %217 = vperm.xlu0 %451, %v211_v20  }
  0x15   :  { %222 = vperm.xlu1 %452, %v212_v21  }
  0x16   :  { %423 = vmatmul.mubr.msk.bf16.gmra.mrb[4].mxu0 %vm113_vm0, %v456_v19  ;;  %v305_v19 = vld [vmem:[%s622_s5] sm:$0x3]  ;;  %s381_s5 = sshll.u32 %s490_s13, 4  ;;  %s382_s5 = int_to_ptr.vmem [resolvable:$true] %s381_s5 }
  0x17   :  { %442 = vmatprep.mubr.msk.bf16.mxu0 %vm489_vm3, %v488_v63  ;;  %s463_s14 = scalar_lea.vmem %s382_s5, 16  ;;  %s467_s15 = scalar_lea.vmem %s382_s5, 32 }
  0x18   :  { %227 = vperm.xlu0 %451, %v213_v22   ;;  %p464_p0 = scmp.ne.s32.totalorder %s382_s5, %s463_s14  ;;  %p468_p1 = scmp.lt.s32.totalorder %s382_s5, %s382_s5 }
  0x19   :  { %232 = vperm.xlu1 %452, %v214_v23   ;;  %p469_p2 = scmp.lt.s32.totalorder %s467_s15, %s463_s14 }
  0x1b   :  { %p470_p3 = por %p469_p2, %p468_p1 }
  0x1c   :  { %311 = vperm.xlu0 %451, %v308_v24  }
  0x1d   :  { %p471_p4 = pnand %p470_p3, %p464_p0 }
  0x81   :  { %v59_v27 = vpop.permute.xlu1 %58 }
  0x83   :  { %v49_v26 = vpop.permute.xlu0 %48 }
  0x85   :  { %v64_v29 = vpop.permute.xlu1 %63 }
  0x87   :  { %v54_v28 = vpop.permute.xlu0 %53 }
  0x8b   :  { %v69_v33 = vpop.permute.xlu0 %68 }
  0x8c   :  { %v74_v38 = vpop.permute.xlu1 %73 }
  0x8f   :  { %v79_v45 = vpop.permute.xlu0 %78 }
  0x90   :  { %v84_v50 = vpop.permute.xlu1 %83 }
  0x93   :  { %v218_v1 = vpop.permute.xlu0 %217 }
  0x94   :  { %v223_v2 = vpop.permute.xlu1 %222 }
  0x97   :  { %v228_v3 = vpop.permute.xlu0 %227 }
  0x98   :  { %v233_v7 = vpop.permute.xlu1 %232 }
  0x9b   :  { %v312_v20 = vpop.permute.xlu0 %311 }
  0xe1   :  { %v420_v30 = vpop.f32.mrb[0].mxu0 }
  0xe2   :  { %v173_v31 = vadd.f32 %v420_v30, %v59_v27  ;;  %v164_v32 = vpop.f32.mrb[1].mxu0  ;;  %v361_v27 = vrot.slane %v534_v0, 7 }
  0xe3   :  { %v165_v34 = vadd.f32 %v164_v32, %v49_v26  ;;  %v421_v35 = vpop.f32.mrb[2].mxu0 }
  0xe4   :  { %v176_v36 = vadd.f32 %v421_v35, %v64_v29  ;;  %v167_v37 = vpop.f32.mrb[3].mxu0  ;;  %v197_v40 = vmax.f32 %v173_v31, 0.0 }
  0xe5   :  { %v168_v39 = vadd.f32 %v167_v37, %v54_v28  ;;  %v195_v42 = vmax.f32 %v165_v34, 0.0 }
  0xe6   :  { %v198_v41 = vmax.f32 %v176_v36, 0.0 }
  0xe7   :  { %v196_v43 = vmax.f32 %v168_v39, 0.0 }
  0xe8   :  { %v208_v44 = vpack.c.bf16 %v198_v41, %v197_v40 }
  0xe9   :  { %v424_v46 = vpop.f32.mrb[4].mxu0  ;;  %v207_v47 = vpack.c.bf16 %v196_v43, %v195_v42 }
  0xea   :  { %v189_v48 = vadd.f32 %v424_v46, %v79_v45  ;;  %v180_v49 = vpop.f32.mrb[5].mxu0 }
  0xeb   :  { %v181_v51 = vadd.f32 %v180_v49, %v69_v33  ;;  %v425_v52 = vpop.f32.mrb[6].mxu0  ;;  %426 = vmatprep.subr.bf16.mxu1 %v207_v47 }
  0xec   :  { %v192_v53 = vadd.f32 %v425_v52, %v84_v50  ;;  %v183_v54 = vpop.f32.mrb[7].mxu0  ;;  %427 = vmatpush3.bf16.msra.mxu1 %v207_v47  ;;  %v201_v56 = vmax.f32 %v189_v48, 0.0 }
  0xed   :  { %v184_v55 = vadd.f32 %v183_v54, %v74_v38  ;;  %428 = vmatprep.subr.bf16.mxu1 %v208_v44  ;;  %v199_v58 = vmax.f32 %v181_v51, 0.0 }
  0xee   :  { %v202_v57 = vmax.f32 %v192_v53, 0.0 }
  0xef   :  { %v200_v59 = vmax.f32 %v184_v55, 0.0 }
  0xf0   :  { %v210_v60 = vpack.c.bf16 %v202_v57, %v201_v56  ;;  %429 = vmatpush3.bf16.msra.mxu1 %v208_v44 }
  0xf1   :  { %v209_v61 = vpack.c.bf16 %v200_v59, %v199_v58 }
  0xf3   :  { %430 = vmatprep.subr.bf16.mxu1 %v209_v61 }
  0xf4   :  { %431 = vmatpush3.bf16.msra.mxu1 %v209_v61 }
  0xf5   :  { %432 = vmatprep.subr.bf16.mxu1 %v210_v60 }
  0xf8   :  { %433 = vmatpush3.bf16.msra.mxu1 %v210_v60 }
  0xfb   :  { %435 = vmatmul.mubr.msk.bf16.vlgmr.msra.gmra.mrb[0].mxu1 %vm245_vm2, %v458_v62 }
 0x1ce   :  { %v436_v4 = vpop.f32.mrb[0].mxu1 }
 0x1cf   :  { %v295_v5 = vadd.f32 %v436_v4, %v228_v3  ;;  %v286_v6 = vpop.f32.mrb[1].mxu1 }
 0x1d0   :  { %v287_v8 = vadd.f32 %v286_v6, %v218_v1  ;;  %v437_v9 = vpop.f32.mrb[2].mxu1 }
 0x1d1   :  { %v298_v10 = vadd.f32 %v437_v9, %v233_v7  ;;  %v289_v11 = vpop.f32.mrb[3].mxu1  ;;  %v303_v13 = vmax.f32 %v295_v5, 0.0 }
 0x1d2   :  { %v290_v12 = vadd.f32 %v289_v11, %v223_v2  ;;  %v301_v15 = vmax.f32 %v287_v8, 0.0 }
 0x1d3   :  { %v304_v14 = vmax.f32 %v298_v10, 0.0 }
 0x1d4   :  { %v302_v16 = vmax.f32 %v290_v12, 0.0 }
 0x1d5   :  { %v307_v17 = vpack.c.bf16 %v304_v14, %v303_v13 }
 0x1d6   :  { %v306_v18 = vpack.c.bf16 %v302_v16, %v301_v15 }
 0x1d8   :  { %439 = vmatpush3.bf16.msra.mxu0 %v306_v18 }
 0x1d9   :  { %440 = vmatprep.subr.bf16.mxu0 %v488_v63 }
 0x1dc   :  { %441 = vmatpush3.bf16.msra.mxu0 %v307_v17 }
 0x1df   :  { %443 = vmatmul.mubr.msk.bf16.vlgmr.msra.gmra.mrb[8].mxu0 %vm314_vm4, %v305_v19 }
 0x2b2   :  { %v352_v21 = vpop.f32.mrb[8].mxu0 }
 0x2b3   :  { %v353_v22 = vadd.f32 %v352_v21, %v312_v20  ;;  %v444_v23 = vpop.f32.mrb[9].mxu0 }
 0x2b4   :  { %v355_v24 = vpop.f32.mrb[10].mxu0 }
 0x2b5   :  { %v358_v25 = vmul.f32 1.442695, %v353_v22  ;;  %v445_v26 = vpop.f32.mrb[11].mxu0  ;;  %v371_v33 = vrot.slane %v353_v22, 2 }
 0x2b7   :  { %459 = vpow2.f32 %v358_v25 }
 0x2c1   :  { %v460_v28 = vpop.eup %459 }
 0x2c2   :  { %v363_v29 = vmul.f32 %v460_v28, %v361_v27 }
 0x2c4   :  { %v365_v30 = vrot.slane %v363_v29, 1 }
 0x2c6   :  { %v367_v31 = vsub.f32 %v353_v22, %v365_v30 }
 0x2c8   :  { %v368_v32 = vmul.f32 1.442695, %v367_v31 }
 0x2ca   :  { %461 = vpow2.f32 %v368_v32 }
 0x2d4   :  { %v462_v34 = vpop.eup %461 }
 0x2d5   :  { %v373_v35 = vadd.f32 %v462_v34, %v371_v33 }
 0x2d7   :  { %374 = vst [vmem:[#allocation2] sm:$0x1] %v373_v35 }
 0x2d8   :  { %474 = shalt.err (!%p471_p4)
}
 0x2d9   :  { %s475_s18 = scalar_lea.hbm %s624_s7, 16 }
 0x2da   :  { %p476_p5 = scmp.ne.s32.totalorder %s624_s7, %s475_s18  ;;  %p479_p6 = scmp.lt.u32.totalorder %s475_s18, %s624_s7 }
 0x2dc   :  { %p481_p7 = pnand %p479_p6, %p476_p5 }
 0x2de   :  { %484 = shalt.err (!%p481_p7)
}
 0x2df   :  { %384 = dma.vmem_to_hbm [thread:$0]  %s382_s5, 16, %s624_s7, [#allocation3]  }
 0x2e0   :  { %485 = dma.done.wait [#allocation3], 16  }
 0x2e1   :  { %486 = vsyncadd [#allocation3], 4294967280 }
 0x2e2   :  { %388 = vsyncpa [#allocation3], 1 }

</bundles_post_ra>
